<compile_context>
chip_gen: v7x
topology: tpu7x:2x2x1
jax: 0.10.0
libtpu: 0.0.40
codegen_flags: <defaults>
</compile_context>

<pallas_src>
import functools

import jax
import jax.numpy as jnp
from jax.experimental import pallas as pl
from jax.experimental.pallas import tpu as pltpu

_LANE = 128     # vreg lane width (last dim)
_SUBLANE = 8    # f32 sublane granularity (second-to-last dim)


def _round_up(x, m):
    return (x + m - 1) // m * m


def _round_down(x, m):
    return (x // m) * m


def _vmem_capacity_bytes():
    """Physical VMEM per TensorCore; conservative 64 MiB (v7x) if unknown."""
    try:
        return int(pltpu.get_tpu_info().vmem_capacity_bytes)
    except Exception:
        return 64 << 20


def _tm_cap():
    """Generation-aware row-tile cap (v5e: tighter scoped VMEM / 1 vst slot)."""
    try:
        kind = jax.devices()[0].device_kind.lower()
    except Exception:
        return 512
    return 512 if "v5" in kind else 1024


# --------------------------------------------------------------------------
# Fused path: whole MLP in one kernel, weights resident in VMEM.
# --------------------------------------------------------------------------
def _fused_mlp_kernel(x_ref, *refs, num_layers, dims_pad, compute_dtype,
                      use_scratch):
    """refs = (w0,b0, ..., w_{L-1},b_{L-1}, o_ref[, s0, s1]).

    x_ref: (tm, D0p) f32; w_i: (D_i_p, D_{i+1}_p) compute_dtype;
    b_i: (1, D_{i+1}_p) f32; o_ref: (tm, D_L_p) f32;
    s0/s1: (tm, max_dpad) f32 ping-pong scratch bounding intermediate live range.
    """
    o_ref = refs[2 * num_layers]
    scratch = refs[2 * num_layers + 1:]
    h = x_ref[...]
    for i in range(num_layers):                 # static Python loop over layers
        w_ref = refs[2 * i]
        b_ref = refs[2 * i + 1]
        acc = jnp.dot(h.astype(compute_dtype), w_ref[...],
                      preferred_element_type=jnp.float32)
        acc = acc + b_ref[...]                  # (1, N) broadcasts over rows (f32)
        if i < num_layers - 1:
            acc = jnp.maximum(acc, 0.0)         # fused ReLU (VPU)
            if use_scratch:
                d = dims_pad[i + 1]
                s = scratch[i % 2]
                s[:, :d] = acc                  # materialize -> bound live range
                h = s[:, :d]
            else:
                h = acc
        else:
            o_ref[...] = acc.astype(o_ref.dtype)


# --------------------------------------------------------------------------
# Fallback path: one tiled matmul+bias(+ReLU) pallas_call per layer, for
# weight sets too large to keep resident in VMEM.
# --------------------------------------------------------------------------
def _tiled_linear(x2d, w, b, apply_relu, compute_dtype):
    M, K = x2d.shape
    _, N = w.shape
    tm = min(512, _round_up(M, _SUBLANE))
    tk = min(512, _round_up(K, _LANE))
    tn = min(512, _round_up(N, _LANE))
    Mp, Kp, Np = _round_up(M, tm), _round_up(K, tk), _round_up(N, tn)

    x_p = x2d if (Mp == M and Kp == K) else jnp.pad(x2d, ((0, Mp - M), (0, Kp - K)))
    w_p = w.astype(compute_dtype)
    if (Kp, Np) != w.shape:
        w_p = jnp.pad(w_p, ((0, Kp - K), (0, Np - N)))
    b_p = jnp.pad(b.astype(jnp.float32).reshape(1, -1), ((0, 0), (0, Np - N)))

    def kernel(x_ref, w_ref, b_ref, o_ref, acc_ref):
        @pl.when(pl.program_id(2) == 0)
        def _():
            acc_ref[...] = jnp.zeros_like(acc_ref)

        acc_ref[...] += jnp.dot(x_ref[...].astype(compute_dtype), w_ref[...],
                                preferred_element_type=jnp.float32)

        @pl.when(pl.program_id(2) == pl.num_programs(2) - 1)
        def _():
            r = acc_ref[...] + b_ref[...]
            if apply_relu:
                r = jnp.maximum(r, 0.0)
            o_ref[...] = r.astype(o_ref.dtype)

    out = pl.pallas_call(
        kernel,
        out_shape=jax.ShapeDtypeStruct((Mp, Np), jnp.float32),
        grid_spec=pltpu.PrefetchScalarGridSpec(
            num_scalar_prefetch=0,
            grid=(Mp // tm, Np // tn, Kp // tk),
            in_specs=[
                pl.BlockSpec((tm, tk), lambda i, j, k: (i, k)),
                pl.BlockSpec((tk, tn), lambda i, j, k: (k, j)),
                pl.BlockSpec((1, tn), lambda i, j, k: (0, j)),
            ],
            out_specs=pl.BlockSpec((tm, tn), lambda i, j, k: (i, j)),
            scratch_shapes=[pltpu.VMEM((tm, tn), jnp.float32)],
        ),
        compiler_params=pltpu.CompilerParams(
            dimension_semantics=("parallel", "parallel", "arbitrary")),
    )(x_p, w_p, b_p)
    return out[:M, :N]


# --------------------------------------------------------------------------
# Public wrapper
# --------------------------------------------------------------------------
def mlp_forward(x, params, *, compute_dtype=jnp.bfloat16, force_tiled=False):
    """x: (..., input_dim); params: list of (w[in,out], b[out]).

    compute_dtype: MXU operand dtype (bf16 default; f32 matches reference
    numerics closely).  Accumulation / bias / ReLU are always f32.
    """
    orig_shape = x.shape
    in_dim = orig_shape[-1]
    out_dim = params[-1][0].shape[1]
    num_layers = len(params)

    x2d = x.reshape(-1, in_dim).astype(jnp.float32)
    M = x2d.shape[0]

    dims = [in_dim] + [w.shape[1] for (w, _) in params]
    dims_pad = [_round_up(d, _LANE) for d in dims]
    max_dpad = max(dims_pad)
    use_scratch = num_layers > 2

    bytes_f32 = 4
    bytes_c = jnp.dtype(compute_dtype).itemsize

    # VMEM-resident footprint of padded weights + biases.
    resident = sum(dims_pad[i] * dims_pad[i + 1] for i in range(num_layers)) * bytes_c
    resident += sum(dims_pad[1:]) * bytes_f32

    # Per-row streaming + intermediate footprint (double-buffered x/out tiles,
    # ping-pong scratch or live intermediates, one live acc + one bf16 copy).
    if use_scratch:
        inter_per_row = 2 * max_dpad * bytes_f32
    else:
        inter_per_row = sum(dims_pad[1:-1]) * bytes_f32
    per_row = (2 * dims_pad[0] + 2 * dims_pad[-1]) * bytes_f32 \
        + inter_per_row + max_dpad * bytes_f32 + max_dpad * bytes_c

    physical = _vmem_capacity_bytes()
    usable = int(0.85 * physical)
    fused_ok = (not force_tiled) and (resident + _SUBLANE * per_row <= usable)

    if not fused_ok:
        # Tiled-weight fallback: weights too large to stay VMEM-resident.
        h = x2d
        for i, (w, b) in enumerate(params):
            h = _tiled_linear(h, w, b, apply_relu=(i < num_layers - 1),
                              compute_dtype=compute_dtype)
        return h[:, :out_dim].reshape(*orig_shape[:-1], out_dim)

    # ---- fused path ----
    M_pad0 = _round_up(max(M, _SUBLANE), _SUBLANE)
    tm_budget = (usable - resident) // per_row
    tm = min(_tm_cap(), M_pad0, max(_SUBLANE, _round_down(tm_budget, _SUBLANE)))
    # Guarantee >=2 grid steps where possible so the parallel axis can shard
    # across v7x's 2 TensorCores (and pipelining has something to overlap).
    if M_pad0 // tm < 2 and M_pad0 > _SUBLANE:
        tm = _round_up(-(-M_pad0 // 2), _SUBLANE)
    M_pad = _round_up(M_pad0, tm)

    # Pad activations only when actually needed (no extra HBM round trip).
    if M_pad == M and dims_pad[0] == in_dim:
        x_p = x2d
    else:
        x_p = jnp.pad(x2d, ((0, M_pad - M), (0, dims_pad[0] - in_dim)))

    flat_inputs = [x_p]
    in_specs = [pl.BlockSpec((tm, dims_pad[0]), lambda i: (i, 0))]
    for li, (w, b) in enumerate(params):
        kin, kout = w.shape
        kin_p, kout_p = dims_pad[li], dims_pad[li + 1]
        w_p = w.astype(compute_dtype)
        if (kin_p, kout_p) != (kin, kout):
            w_p = jnp.pad(w_p, ((0, kin_p - kin), (0, kout_p - kout)))
        b_p = jnp.pad(b.astype(jnp.float32).reshape(1, -1),
                      ((0, 0), (0, kout_p - kout)))
        flat_inputs += [w_p, b_p]
        # Constant index_maps -> weights/biases DMA'd once, VMEM-resident.
        in_specs += [
            pl.BlockSpec((kin_p, kout_p), lambda i: (0, 0)),
            pl.BlockSpec((1, kout_p), lambda i: (0, 0)),
        ]

    scratch_shapes = ([pltpu.VMEM((tm, max_dpad), jnp.float32)] * 2
                      if use_scratch else [])

    # Explicit VMEM limit (default scoped limit is 16/32 MiB, far below need
    # once weights are resident and tiles are large).
    est = resident + tm * per_row
    vmem_limit = int(min(0.9 * physical, max(1.5 * est + (2 << 20), 32 << 20)))

    kernel = functools.partial(
        _fused_mlp_kernel, num_layers=num_layers, dims_pad=tuple(dims_pad),
        compute_dtype=compute_dtype, use_scratch=use_scratch)

    out_p = pl.pallas_call(
        kernel,
        out_shape=jax.ShapeDtypeStruct((M_pad, dims_pad[-1]), jnp.float32),
        grid_spec=pltpu.PrefetchScalarGridSpec(
            num_scalar_prefetch=0,
            grid=(M_pad // tm,),
            in_specs=in_specs,
            out_specs=pl.BlockSpec((tm, dims_pad[-1]), lambda i: (i, 0)),
            scratch_shapes=scratch_shapes,
        ),
        compiler_params=pltpu.CompilerParams(
            dimension_semantics=("parallel",),
            vmem_limit_bytes=vmem_limit,
        ),
    )(*flat_inputs)

    out = out_p[:M, :out_dim]
    return out.reshape(*orig_shape[:-1], out_dim)


def init_mlp_params(key, input_dim, hidden_dim, output_dim, num_layers):
    """Matches nn.Linear's default uniform(-1/sqrt(in), 1/sqrt(in)) init."""
    h = [hidden_dim] * (num_layers - 1)
    dims_in = [input_dim] + h
    dims_out = h + [output_dim]
    params = []
    for n, k in zip(dims_in, dims_out):
        key, kw, kb = jax.random.split(key, 3)
        bound = 1.0 / (n ** 0.5)
        # stored as (in_dim, out_dim) == PyTorch weight.T (identical math)
        w = jax.random.uniform(kw, (n, k), jnp.float32, -bound, bound)
        b = jax.random.uniform(kb, (k,), jnp.float32, -bound, bound)
        params.append((w, b))
    return params


def mlp_reference(x, params):
    num_layers = len(params)
    for i, (w, b) in enumerate(params):
        x = x @ w + b
        if i < num_layers - 1:
            x = jnp.maximum(x, 0.0)
    return x


if __name__ == "__main__":
    key = jax.random.PRNGKey(0)
    kx, kp = jax.random.split(key)

    batch, seq = 2, 8
    input_dim, hidden_dim, output_dim, num_layers = 32, 64, 16, 3

    x = jax.random.normal(kx, (batch, seq, input_dim), jnp.float32)
    params = init_mlp_params(kp, input_dim, hidden_dim, output_dim, num_layers)
    ref = mlp_reference(x, params)

    # 1) Default fused path: bf16 MXU operands, f32 accumulation.
    out = jax.block_until_ready(mlp_forward(x, params))
    assert out.shape == (batch, seq, output_dim), out.shape
    assert jnp.allclose(out, ref, atol=5e-2, rtol=5e-2), "bf16 fused mismatch"

    # 2) Fused path with f32 operands (original numerics).
    out_f32 = jax.block_until_ready(mlp_forward(x, params,
                                                compute_dtype=jnp.float32))
    assert jnp.allclose(out_f32, ref, atol=1e-5, rtol=1e-5), "f32 fused mismatch"

    # 3) Tiled-weight fallback (large-FFN path), forced so it is exercised.
    out_tiled = jax.block_until_ready(mlp_forward(x, params, force_tiled=True,
                                                  compute_dtype=jnp.float32))
    assert jnp.allclose(out_tiled, ref, atol=1e-5, rtol=1e-5), "tiled mismatch"

    print("KERNEL_OK")
</pallas_src>

<mosaic_0001>
module attributes {stable_mosaic.version = 11 : i64} {
  func.func @_fused_mlp_kernel(%arg0: i32, %arg1: memref<8x128xf32, #tpu.memory_space<vmem>>, %arg2: memref<128x128xbf16, #tpu.memory_space<vmem>>, %arg3: memref<1x128xf32, #tpu.memory_space<vmem>>, %arg4: memref<128x128xbf16, #tpu.memory_space<vmem>>, %arg5: memref<1x128xf32, #tpu.memory_space<vmem>>, %arg6: memref<128x128xbf16, #tpu.memory_space<vmem>>, %arg7: memref<1x128xf32, #tpu.memory_space<vmem>>, %arg8: memref<8x128xf32, #tpu.memory_space<vmem>>, %arg9: memref<8x128xf32, #tpu.memory_space<vmem>>, %arg10: memref<8x128xf32, #tpu.memory_space<vmem>>) attributes {dimension_semantics = [#tpu.dimension_semantics<parallel>], iteration_bounds = array<i64: 2>, scalar_prefetch = 0 : i64, scratch_operands = 2 : i64, tpu.core_type = #tpu.core_type<tc>, window_params = [{transform_indices = @transform_0, window_bounds = array<i64: 8, 128>}, {pipeline_mode = #tpu.pipeline_mode<synchronous>, transform_indices = @transform_1, window_bounds = array<i64: 128, 128>}, {pipeline_mode = #tpu.pipeline_mode<synchronous>, transform_indices = @transform_2, window_bounds = array<i64: 1, 128>}, {pipeline_mode = #tpu.pipeline_mode<synchronous>, transform_indices = @transform_3, window_bounds = array<i64: 128, 128>}, {pipeline_mode = #tpu.pipeline_mode<synchronous>, transform_indices = @transform_4, window_bounds = array<i64: 1, 128>}, {pipeline_mode = #tpu.pipeline_mode<synchronous>, transform_indices = @transform_5, window_bounds = array<i64: 128, 128>}, {pipeline_mode = #tpu.pipeline_mode<synchronous>, transform_indices = @transform_6, window_bounds = array<i64: 1, 128>}, {transform_indices = @transform_7, window_bounds = array<i64: 8, 128>}]} {
    %c0 = arith.constant 0 : index
    %c0_0 = arith.constant 0 : index
    %0 = vector.load %arg1[%c0, %c0_0] : memref<8x128xf32, #tpu.memory_space<vmem>>, vector<8x128xf32>
    %1 = arith.truncf %0 : vector<8x128xf32> to vector<8x128xbf16>
    %c0_1 = arith.constant 0 : index
    %c0_2 = arith.constant 0 : index
    %2 = vector.load %arg2[%c0_1, %c0_2] : memref<128x128xbf16, #tpu.memory_space<vmem>>, vector<128x128xbf16>
    %cst = arith.constant dense<0.000000e+00> : vector<8x128xf32>
    %3 = tpu.matmul %1, %2, %cst {dimension_numbers = #tpu.dot_dimension_numbers<[1], [0], [0], [1], [0, 0, 1, 1], [], []>} : vector<8x128xbf16>, vector<128x128xbf16>, vector<8x128xf32> -> vector<8x128xf32>
    %c0_3 = arith.constant 0 : index
    %c0_4 = arith.constant 0 : index
    %4 = vector.load %arg3[%c0_3, %c0_4] : memref<1x128xf32, #tpu.memory_space<vmem>>, vector<1x128xf32>
    %5 = vector.broadcast %4 : vector<1x128xf32> to vector<8x128xf32>
    %6 = arith.addf %3, %5 : vector<8x128xf32>
    %cst_5 = arith.constant 0.000000e+00 : f32
    %7 = vector.broadcast %cst_5 : f32 to vector<8x128xf32>
    %8 = arith.maximumf %6, %7 : vector<8x128xf32>
    %c0_6 = arith.constant 0 : index
    %c0_7 = arith.constant 0 : index
    %9 = vector.load %arg9[%c0_6, %c0_7] : memref<8x128xf32, #tpu.memory_space<vmem>>, vector<8x128xf32>
    tpu.vector_store %arg9[%c0_6, %c0_7], %8 {strides = array<i32>} : memref<8x128xf32, #tpu.memory_space<vmem>>, vector<8x128xf32>,
    %c0_8 = arith.constant 0 : index
    %c0_9 = arith.constant 0 : index
    %10 = vector.load %arg9[%c0_8, %c0_9] : memref<8x128xf32, #tpu.memory_space<vmem>>, vector<8x128xf32>
    %11 = arith.truncf %10 : vector<8x128xf32> to vector<8x128xbf16>
    %c0_10 = arith.constant 0 : index
    %c0_11 = arith.constant 0 : index
    %12 = vector.load %arg4[%c0_10, %c0_11] : memref<128x128xbf16, #tpu.memory_space<vmem>>, vector<128x128xbf16>
    %cst_12 = arith.constant dense<0.000000e+00> : vector<8x128xf32>
    %13 = tpu.matmul %11, %12, %cst_12 {dimension_numbers = #tpu.dot_dimension_numbers<[1], [0], [0], [1], [0, 0, 1, 1], [], []>} : vector<8x128xbf16>, vector<128x128xbf16>, vector<8x128xf32> -> vector<8x128xf32>
    %c0_13 = arith.constant 0 : index
    %c0_14 = arith.constant 0 : index
    %14 = vector.load %arg5[%c0_13, %c0_14] : memref<1x128xf32, #tpu.memory_space<vmem>>, vector<1x128xf32>
    %15 = vector.broadcast %14 : vector<1x128xf32> to vector<8x128xf32>
    %16 = arith.addf %13, %15 : vector<8x128xf32>
    %cst_15 = arith.constant 0.000000e+00 : f32
    %17 = vector.broadcast %cst_15 : f32 to vector<8x128xf32>
    %18 = arith.maximumf %16, %17 : vector<8x128xf32>
    %c0_16 = arith.constant 0 : index
    %c0_17 = arith.constant 0 : index
    %19 = vector.load %arg10[%c0_16, %c0_17] : memref<8x128xf32, #tpu.memory_space<vmem>>, vector<8x128xf32>
    tpu.vector_store %arg10[%c0_16, %c0_17], %18 {strides = array<i32>} : memref<8x128xf32, #tpu.memory_space<vmem>>, vector<8x128xf32>,
    %c0_18 = arith.constant 0 : index
    %c0_19 = arith.constant 0 : index
    %20 = vector.load %arg10[%c0_18, %c0_19] : memref<8x128xf32, #tpu.memory_space<vmem>>, vector<8x128xf32>
    %21 = arith.truncf %20 : vector<8x128xf32> to vector<8x128xbf16>
    %c0_20 = arith.constant 0 : index
    %c0_21 = arith.constant 0 : index
    %22 = vector.load %arg6[%c0_20, %c0_21] : memref<128x128xbf16, #tpu.memory_space<vmem>>, vector<128x128xbf16>
    %cst_22 = arith.constant dense<0.000000e+00> : vector<8x128xf32>
    %23 = tpu.matmul %21, %22, %cst_22 {dimension_numbers = #tpu.dot_dimension_numbers<[1], [0], [0], [1], [0, 0, 1, 1], [], []>} : vector<8x128xbf16>, vector<128x128xbf16>, vector<8x128xf32> -> vector<8x128xf32>
    %c0_23 = arith.constant 0 : index
    %c0_24 = arith.constant 0 : index
    %24 = vector.load %arg7[%c0_23, %c0_24] : memref<1x128xf32, #tpu.memory_space<vmem>>, vector<1x128xf32>
    %25 = vector.broadcast %24 : vector<1x128xf32> to vector<8x128xf32>
    %26 = arith.addf %23, %25 : vector<8x128xf32>
    %c0_25 = arith.constant 0 : index
    %c0_26 = arith.constant 0 : index
    %27 = vector.load %arg8[%c0_25, %c0_26] : memref<8x128xf32, #tpu.memory_space<vmem>>, vector<8x128xf32>
    tpu.vector_store %arg8[%c0_25, %c0_26], %26 {strides = array<i32>} : memref<8x128xf32, #tpu.memory_space<vmem>>, vector<8x128xf32>,
    return
  }
  func.func @transform_0(%arg0: i32) -> (i32, i32) {
    %c0_i32 = arith.constant 0 : i32
    %c0_i32_0 = arith.constant 0 : i32
    return %arg0, %c0_i32 : i32, i32
  }
  func.func @transform_1(%arg0: i32) -> (i32, i32) {
    %c0_i32 = arith.constant 0 : i32
    %c0_i32_0 = arith.constant 0 : i32
    %c0_i32_1 = arith.constant 0 : i32
    return %c0_i32, %c0_i32_0 : i32, i32
  }
  func.func @transform_2(%arg0: i32) -> (i32, i32) {
    %c0_i32 = arith.constant 0 : i32
    %c0_i32_0 = arith.constant 0 : i32
    %c0_i32_1 = arith.constant 0 : i32
    return %c0_i32, %c0_i32_0 : i32, i32
  }
  func.func @transform_3(%arg0: i32) -> (i32, i32) {
    %c0_i32 = arith.constant 0 : i32
    %c0_i32_0 = arith.constant 0 : i32
    %c0_i32_1 = arith.constant 0 : i32
    return %c0_i32, %c0_i32_0 : i32, i32
  }
  func.func @transform_4(%arg0: i32) -> (i32, i32) {
    %c0_i32 = arith.constant 0 : i32
    %c0_i32_0 = arith.constant 0 : i32
    %c0_i32_1 = arith.constant 0 : i32
    return %c0_i32, %c0_i32_0 : i32, i32
  }
  func.func @transform_5(%arg0: i32) -> (i32, i32) {
    %c0_i32 = arith.constant 0 : i32
    %c0_i32_0 = arith.constant 0 : i32
    %c0_i32_1 = arith.constant 0 : i32
    return %c0_i32, %c0_i32_0 : i32, i32
  }
  func.func @transform_6(%arg0: i32) -> (i32, i32) {
    %c0_i32 = arith.constant 0 : i32
    %c0_i32_0 = arith.constant 0 : i32
    %c0_i32_1 = arith.constant 0 : i32
    return %c0_i32, %c0_i32_0 : i32, i32
  }
  func.func @transform_7(%arg0: i32) -> (i32, i32) {
    %c0_i32 = arith.constant 0 : i32
    %c0_i32_0 = arith.constant 0 : i32
    return %arg0, %c0_i32 : i32, i32
  }
}

</mosaic_0001>

<bundles_post_ra>
// kernel: tpu_custom_call.1
= control target key start
LH: loop header
LB: loop body
LE: loop exit
PB: predicated region body
PF: predicated region fallthrough
CT: control target
= control target key end

     0   :  { %12 = vsyncpa [#allocation5], 0  ;;  %s1581_s0 = inlined_call_operand.hbm [shape: f32[16,128], index: 0, kind: input, shape index: {}]   ;;  %s1582_s1 = inlined_call_operand.hbm [shape: bf16[128,128], index: 1, kind: input, shape index: {}]   ;;  %s1583_s2 = inlined_call_operand.vmem [shape: f32[1,128], index: 2, kind: input, shape index: {}]   ;;  %s1584_s3 = inlined_call_operand.hbm [shape: bf16[128,128], index: 3, kind: input, shape index: {}]   ;;  %s1585_s4 = inlined_call_operand.vmem [shape: f32[1,128], index: 4, kind: input, shape index: {}]   ;;  %s1586_s5 = inlined_call_operand.hbm [shape: bf16[128,128], index: 5, kind: input, shape index: {}]   ;;  %s1587_s6 = inlined_call_operand.vmem [shape: f32[1,128], index: 6, kind: input, shape index: {}]   ;;  %s1588_s7 = inlined_call_operand.hbm [shape: f32[16,128], index: 7, kind: output, shape index: {}]  }
   0x1   :  { %14 = vsyncpa [#allocation5 + $0x1], 0 }
   0x2   :  { %15 = vsyncpa [#allocation8], 0 }
   0x3   :  { %16 = vsyncpa [#allocation11], 0 }
   0x4   :  { %17 = vsyncpa [#allocation6], 0 }
   0x5   :  { %19 = vsyncpa [#allocation6 + $0x1], 0  ;;  %s1272_s24 = smov 0   ;;  %s1274_s25 = smov 0  }
   0x6   :  { %s1276_s26 = smov 0   ;;  %s1278_s27 = smov 0  }
   0x7 LB: > { %s1293_s28 = sadd.s32 4294967295, %s1221_s27   ;;  %s796_s29 = sadd.s32 4294967294, %s1221_s27   ;;  %s1221_s27 = sphi %s1278_s27, %s1614_s27   ;;  %s1217_s26 = sphi %s1276_s26, %s1613_s26   ;;  %s1213_s25 = sphi %s1274_s25, %s1612_s25   ;;  %s1209_s24 = sphi %s1272_s24, %s1611_s24  }
   0x8   : > { %p45_p0 = scmp.ne.s32.totalorder %s1213_s25, %s1209_s24  ;;  %p1589_p1 = scmp.eq.s32.totalorder %s1293_s28, 0 }
   0x9   : > { %p201_p3 = scmp.eq.s32.totalorder %s796_s29, 1  ;;  %p797_p5 = scmp.ge.s32.totalorder %s1221_s27, 1 }
   0xa   : > { %p1302_p4 = por %p1589_p1, %p45_p0  ;;  %p208_p7 = scmp.lt.s32.totalorder %s1221_s27, 3 }
   0xb   : > { %p1307_p6 = por %p201_p3, %p45_p0  ;;  %s1223_s10 = smov [#allocation7]  }
   0xc   : > { %s1593_s30 = scalar_select %p1302_p4, 1, 0 }
   0xd   : > { %s1594_s8 = scalar_select %p1307_p6, 1, 0 }
   0xe   : > { %p1312_p8 = pnand %p797_p5, %p208_p7  ;;  %s220_s11 = sshll.u32 %s1223_s10, 4  ;;  %s1316_s11 = int_to_ptr.vmem [resolvable:$true] %s220_s11 }
   0xf   : > { %1595 = sst [smem:[#allocation17_spill]] %s1594_s8  ;;  %s1224_s13 = smov [#allocation9]  }
  0x10   : > { %s1596_s9 = scalar_select %p1312_p8, 1, 0 }
  0x11   : > { %p944_p9 = pneg %p1312_p8  ;;  %s236_s14 = sshll.u32 %s1224_s13, 4  ;;  %s1327_s14 = int_to_ptr.vmem [resolvable:$true] %s236_s14 }
  0x12   : > { %s1225_s15 = smov [#allocation10]   ;;  %s1033_s19 = scalar_lea.hbm %s1582_s1, 1024 }
  0x13   : > { %p1323_p11 = pnand %p944_p9, %p1589_p1  ;;  %s1329_s16 = sshll.u32 %s1225_s15, 4  ;;  %s253_s16 = int_to_ptr.vmem [resolvable:$true] %s1329_s16 }
  0x14   : > { %p1034_p12 = scmp.ne.s32.totalorder %s1582_s1, %s1033_s19  ;;  %p1040_p5 = scmp.lt.u32.totalorder %s1033_s19, %s1582_s1 }
  0x15   : > { %p1339_p13 = pneg %p1323_p11 }
  0x17   : > { %p1036_p0 = pnand %p1339_p13, %p1034_p12 }
  0x19   : > { %p1037_p3 = pneg %p1036_p0 }
  0x1b   : > { %p1042_p7 = pnand %p1040_p5, %p1037_p3 }
  0x1d   : > { %1045 = shalt.err (!%p1042_p7)
}
  0x1e   : > { %s1046_s10 = scalar_lea.vmem %s1316_s11, 1024  ;;  %p1054_p2 = scmp.lt.s32.totalorder %s1316_s11, %s1316_s11 }
  0x1f   : > { %p1047_p9 = scmp.ne.s32.totalorder %s1316_s11, %s1046_s10  ;;  %p1055_p6 = scmp.lt.s32.totalorder %s1046_s10, %s1046_s10 }
  0x21   : > { %p1049_p10 = pnand %p1047_p9, %p1339_p13  ;;  %p1056_p12 = por %p1055_p6, %p1054_p2 }
  0x23   : > { %p1050_p1 = pneg %p1049_p10 }
  0x25   : > { %p1057_p0 = pnand %p1056_p12, %p1050_p1 }
  0x27   : > { %1060 = shalt.err (!%p1057_p0)
}
  0x28   : > { %s1226_s13 = smov 64   ;;  %s1227_s15 = smov 4  }
  0x29   : > { %947 = dma.hbm_to_vmem [thread:$0]  (!%p1323_p11), %s1582_s1, 1024, %s1316_s11, [#allocation8], %s1226_s13, %s1226_s13, %s1227_s15  }
  0x2a   : > { %s1061_s21 = scalar_lea.hbm %s1584_s3, 1024 }
  0x2b   : > { %p1062_p1 = scmp.ne.s32.totalorder %s1584_s3, %s1061_s21  ;;  %p1068_p10 = scmp.lt.u32.totalorder %s1061_s21, %s1584_s3 }
  0x2d   : > { %p1064_p2 = pnand %p1062_p1, %p1339_p13 }
  0x2f   : > { %p1065_p6 = pneg %p1064_p2 }
  0x31   : > { %p1070_p3 = pnand %p1068_p10, %p1065_p6 }
  0x33   : > { %1073 = shalt.err (!%p1070_p3)
}
  0x34   : > { %s1074_s11 = scalar_lea.vmem %s1327_s14, 1024  ;;  %p1082_p12 = scmp.lt.s32.totalorder %s1327_s14, %s1327_s14 }
  0x35   : > { %p1075_p5 = scmp.ne.s32.totalorder %s1327_s14, %s1074_s11  ;;  %p1083_p0 = scmp.lt.s32.totalorder %s1074_s11, %s1074_s11 }
  0x37   : > { %p1077_p7 = pnand %p1075_p5, %p1339_p13  ;;  %p1084_p1 = por %p1083_p0, %p1082_p12 }
  0x39   : > { %p1078_p9 = pneg %p1077_p7 }
  0x3b   : > { %p1085_p2 = pnand %p1084_p1, %p1078_p9 }
  0x3d   : > { %1088 = shalt.err (!%p1085_p2)
}
  0x3e   : > { %950 = dma.hbm_to_vmem [thread:$0]  (!%p1323_p11), %s1584_s3, 1024, %s1327_s14, [#allocation8], %s1226_s13, %s1226_s13, %s1227_s15  }
  0x3f   : > { %s1089_s20 = scalar_lea.hbm %s1586_s5, 1024 }
  0x40   : > { %p1090_p6 = scmp.ne.s32.totalorder %s1586_s5, %s1089_s20  ;;  %p1096_p5 = scmp.lt.u32.totalorder %s1089_s20, %s1586_s5 }
  0x42   : > { %p1092_p10 = pnand %p1090_p6, %p1339_p13 }
  0x44   : > { %p1093_p3 = pneg %p1092_p10 }
  0x46   : > { %p1098_p7 = pnand %p1096_p5, %p1093_p3 }
  0x48   : > { %1101 = shalt.err (!%p1098_p7)
}
  0x49   : > { %s1102_s11 = scalar_lea.vmem %s253_s16, 1024  ;;  %p1110_p1 = scmp.lt.s32.totalorder %s253_s16, %s253_s16 }
  0x4a   : > { %p1103_p9 = scmp.ne.s32.totalorder %s253_s16, %s1102_s11  ;;  %p1111_p2 = scmp.lt.s32.totalorder %s1102_s11, %s1102_s11 }
  0x4c   : > { %p1105_p12 = pnand %p1103_p9, %p1339_p13  ;;  %p1112_p4 = por %p1111_p2, %p1110_p1 }
  0x4e   : > { %p1106_p0 = pneg %p1105_p12 }
  0x50   : > { %p1113_p8 = pnand %p1112_p4, %p1106_p0 }
  0x52   : > { %1116 = shalt.err (!%p1113_p8)
}
  0x53   : > { %953 = dma.hbm_to_vmem [thread:$0]  (!%p1323_p11), %s1586_s5, 1024, %s253_s16, [#allocation11], %s1226_s13, %s1226_s13, %s1227_s15  }
  0x54   : > { %s1412_s22 = sadd.s32 1, %s1221_s27   ;;  %s32_s17 = sadd.s32 1, %s1217_s26 }
  0x55   : > { %s29_s12 = ssub.s32 %s1221_s27, %s1412_s22  ;;  %p39_p8 = scmp.ne.s32.totalorder %s1217_s26, %s1213_s25 }
  0x56   : > { %p30_p4 = scmp.eq.s32.totalorder %s29_s12, 0  ;;  %p40_p13 = scmp.eq.s32.totalorder %s1221_s27, 0 }
  0x57   : > { %p965_p6 = scmp.lt.s32.totalorder %s1221_s27, 2  ;;  %p1599_p3 = scmp.eq.s32.totalorder %s1293_s28, 1 }
  0x58   : > { %s1422_s18 = scalar_select %p30_p4, %s1217_s26, %s32_s17  }
  0x59   : > { %p41_p10 = por %p40_p13, %p39_p8  ;;  %p1426_p5 = por %p1599_p3, %p39_p8 }
  0x5a   : > { %s269_s20 = sand.u32 1, %s1217_s26   ;;  %s803_s21 = sshll.u32 %s1221_s27, 7 }
  0x5b   : > { %s802_s16 = sshll.u32 %s269_s20, 3  ;;  %s1435_s23 = scalar_lea.hbm %s1581_s0, %s803_s21 }
  0x5c   : > { %s273_s29 = scalar_lea.vmem [#allocation4], %s802_s16  ;;  %p1437_p11 = pnand %p965_p6, %p41_p10 }
  0x5d   : > { %s280_s10 = sshll.u32 %s273_s29, 4  ;;  %s270_s14 = scalar_lea.sflag [#allocation5], %s269_s20  ;;  %s1441_s10 = int_to_ptr.vmem [resolvable:$true] %s280_s10 }
  0x5e   : > { %s1117_s8 = scalar_lea.hbm %s1435_s23, 128  ;;  %p1119_p9 = pneg %p1437_p11 }
  0x5f   : > { %p1118_p7 = scmp.ne.s32.totalorder %s1435_s23, %s1117_s8  ;;  %s1122_s21 = scalar_lea.hbm %s1581_s0, 256 }
  0x60   : > { %p1123_p1 = scmp.lt.u32.totalorder %s1435_s23, %s1581_s0  ;;  %p1124_p2 = scmp.lt.u32.totalorder %s1122_s21, %s1117_s8 }
  0x61   : > { %p1120_p12 = pnand %p1119_p9, %p1118_p7  ;;  %p1126_p8 = scmp.lt.u32.totalorder %s1117_s8, %s1435_s23 }
  0x62   : > { %p1125_p4 = por %p1124_p2, %p1123_p1 }
  0x63   : > { %p1121_p0 = pneg %p1120_p12 }
  0x64   : > { %p1127_p13 = por %p1126_p8, %p1125_p4 }
  0x66   : > { %p1128_p6 = pnand %p1127_p13, %p1121_p0 }
  0x68   : > { %1131 = shalt.err (!%p1128_p6)
}
  0x69   : > { %s1132_s20 = scalar_lea.vmem %s1441_s10, 128  ;;  %s1228_s15 = smov [#allocation4]  }
  0x6a   : > { %p1133_p10 = scmp.ne.s32.totalorder %s1441_s10, %s1132_s20  ;;  %s1137_s29 = sshll.u32 %s1228_s15, 4  ;;  %s1138_s29 = int_to_ptr.vmem [resolvable:$false] %s1137_s29 }
  0x6b   : > { %s1139_s12 = scalar_lea.vmem %s1138_s29, 256  ;;  %p1140_p12 = scmp.lt.s32.totalorder %s1441_s10, %s1138_s29 }
  0x6c   : > { %p1135_p3 = pnand %p1133_p10, %p1119_p9  ;;  %p1141_p1 = scmp.lt.s32.totalorder %s1139_s12, %s1132_s20 }
  0x6e   : > { %p1136_p7 = pneg %p1135_p3  ;;  %p1142_p2 = por %p1141_p1, %p1140_p12 }
  0x70   : > { %p1143_p4 = pnand %p1142_p2, %p1136_p7 }
  0x72   : > { %1146 = shalt.err (!%p1143_p4)
}
  0x73   : > { %957 = dma.hbm_to_vmem [thread:$0]  (!%p1437_p11), %s1435_s23, 128, %s1441_s10, %s270_s14  }
  0x74   : > { %p1602_p0 = scmp.ne.s32.totalorder %s1596_s9, 0 }
  0x75   : > { %s1471_s8 = sand.u32 (!%p1602_p0), 1, %s1213_s25   ;;  %p1603_p9 = scmp.ne.s32.totalorder (!%p1602_p0), %s1593_s30, 0 }
  0x76   : > { %289 = sbr.rel (%p1602_p0) target bundleno = 831 (0x33f), region = 48  ;;  %s805_s17 = sshll.u32 (!%p1602_p0), %s1471_s8, 3 }
  0x77   : > { %s292_s21 = scalar_lea.sflag (!%p1602_p0), [#allocation5], %s1471_s8  ;;  %s1477_s16 = scalar_lea.vmem (!%p1602_p0), [#allocation4], %s805_s17 }
  0x7d   : > { %1192 = dma.done.wait (%p1603_p9), %s292_s21, 128  }
  0x7e   : > { %1194 = vsyncadd (%p1603_p9), %s292_s21, 4294967168  ;;  %p1604_p11 = scmp.eq.s32.totalorder %s1293_s28, 0 }
  0x80   : > { %1196 = dma.done.wait (%p1604_p11), [#allocation8], 2048   ;;  %p1605_p8 = pmov %p1604_p11 }
  0x82   : > { %1198 = vsyncadd (%p1605_p8), [#allocation8], 4294965248  ;;  %p1606_p13 = pmov %p1605_p8 }
  0x83   : > { %p1607_p6 = pmov %p1605_p8 }
  0x84   : > { %1200 = dma.done.wait (%p1606_p13), [#allocation11], 1024  }
  0x85   : > { %1202 = vsyncadd (%p1607_p6), [#allocation11], 4294966272  ;;  %v1229_v0 = vmov 0.0   ;;  %vm1230_vm0 = vmmov 0   ;;  %v1009_v1 = vld [vmem:[#allocation7] sm:$0xff]   ;;  %v1010_v2 = vld [vmem:[#allocation7 + $0x8] sm:$0xff]  }
  0x86   : > { %868 = vmatprep.subr.bf16.mxu0 %v1229_v0  ;;  %884 = vmatprep.mubr.msk.bf16.mxu0 %vm1230_vm0, %v1229_v0  ;;  %v1011_v3 = vld [vmem:[#allocation7 + $0x10] sm:$0xff]   ;;  %v1017_v4 = vld [vmem:[#allocation9] sm:$0xff]   ;;  %v1012_v5 = vld [vmem:[#allocation7 + $0x18] sm:$0xff]   ;;  %s838_s13 = sshll.u32 %s1293_s28, 7  ;;  %s337_s20 = scalar_lea.vmem [#allocation12], %s805_s17 }
  0x87   : > { %888 = vmatprep.subr.bf16.mxu1 %v1229_v0  ;;  %904 = vmatprep.mubr.msk.bf16.mxu1 %vm1230_vm0, %v1229_v0  ;;  %v1018_v6 = vld [vmem:[#allocation9 + $0x8] sm:$0xff]   ;;  %v1013_v7 = vld [vmem:[#allocation7 + $0x20] sm:$0xff]   ;;  %v1019_v8 = vld [vmem:[#allocation9 + $0x10] sm:$0xff]   ;;  %s697_s15 = sshll.u32 %s337_s20, 4  ;;  %s1537_s21 = scalar_lea.hbm %s1588_s7, %s838_s13  ;;  %s1539_s15 = int_to_ptr.vmem [resolvable:$true] %s697_s15 }
  0x88   : > { %869 = vmatpush3.bf16.msra.mxu0 %v1009_v1  ;;  %889 = vmatpush3.bf16.msra.mxu1 %v1017_v4  ;;  %v1014_v9 = vld [vmem:[#allocation7 + $0x28] sm:$0xff]   ;;  %v1020_v10 = vld [vmem:[#allocation9 + $0x18] sm:$0xff]   ;;  %v1015_v11 = vld [vmem:[#allocation7 + $0x30] sm:$0xff]   ;;  %s684_s28 = scalar_lea.sflag [#allocation6], %s1471_s8  ;;  %s1231_s17 = smov [#allocation12]  }
  0x89   : > { %870 = vmatprep.subr.bf16.mxu0 %v1229_v0  ;;  %890 = vmatprep.subr.bf16.mxu1 %v1229_v0  ;;  %v1021_v12 = vld [vmem:[#allocation9 + $0x20] sm:$0xff]   ;;  %v1016_v13 = vld [vmem:[#allocation7 + $0x38] sm:$0xff]   ;;  %v1022_v15 = vld [vmem:[#allocation9 + $0x28] sm:$0xff]   ;;  %s1151_s30 = sshll.u32 %s1231_s17, 4  ;;  %s1152_s30 = int_to_ptr.vmem [resolvable:$false] %s1151_s30 }
  0x8a   : > { %v339_v14 = vld [vmem:[%s1477_s16] sm:$0xff]  ;;  %v1025_v19 = vld [vmem:[#allocation10] sm:$0xff]   ;;  %v1026_v20 = vld [vmem:[#allocation10 + $0x8] sm:$0xff]   ;;  %s1147_s16 = scalar_lea.vmem %s1539_s15, 128  ;;  %s1153_s9 = scalar_lea.vmem %s1152_s30, 256 }
  0x8b   : > { %v340_v16 = vpack.c.bf16 %v339_v14, %v339_v14  ;;  %v1023_v17 = vld [vmem:[#allocation9 + $0x30] sm:$0xff]   ;;  %v1024_v18 = vld [vmem:[#allocation9 + $0x38] sm:$0xff]   ;;  %v1029_v23 = vld [vmem:[#allocation10 + $0x20] sm:$0xff]   ;;  %p1148_p10 = scmp.ne.s32.totalorder %s1539_s15, %s1147_s16  ;;  %p1154_p12 = scmp.lt.s32.totalorder %s1539_s15, %s1152_s30 }
  0x8c   : > { %871 = vmatpush3.bf16.msra.mxu0 %v1010_v2  ;;  %891 = vmatpush3.bf16.msra.mxu1 %v1018_v6  ;;  %v1027_v21 = vld [vmem:[#allocation10 + $0x10] sm:$0xff]   ;;  %v1028_v22 = vld [vmem:[#allocation10 + $0x18] sm:$0xff]   ;;  %v1030_v24 = vld [vmem:[#allocation10 + $0x28] sm:$0xff]   ;;  %p1155_p1 = scmp.lt.s32.totalorder %s1153_s9, %s1147_s16 }
  0x8d   : > { %872 = vmatprep.subr.bf16.mxu0 %v1229_v0  ;;  %892 = vmatprep.subr.bf16.mxu1 %v1229_v0  ;;  %v810_v25 = vld [vmem:[%s1583_s2] ss:$0 sm:$0xff]  ;;  %v1032_v34 = vld [vmem:[#allocation10 + $0x38] sm:$0xff]   ;;  %p1149_p3 = pnand %p1148_p10, %p1426_p5 }
  0x8e   : > { %v1031_v33 = vld [vmem:[#allocation10 + $0x30] sm:$0xff]   ;;  %p1156_p2 = por %p1155_p1, %p1154_p12 }
  0x8f   : > { %v819_v35 = vld [vmem:[%s1585_s4] ss:$0 sm:$0xff]  ;;  %p1150_p7 = pneg %p1149_p3 }
  0x90   : > { %873 = vmatpush3.bf16.msra.mxu0 %v1011_v3  ;;  %893 = vmatpush3.bf16.msra.mxu1 %v1019_v8  ;;  %v828_v43 = vld [vmem:[%s1587_s6] ss:$0 sm:$0xff] }
  0x91   : > { %874 = vmatprep.subr.bf16.mxu0 %v1229_v0  ;;  %894 = vmatprep.subr.bf16.mxu1 %v1229_v0  ;;  %p1157_p4 = pnand %p1156_p2, %p1150_p7 }
  0x94   : > { %875 = vmatpush3.bf16.msra.mxu0 %v1012_v5  ;;  %895 = vmatpush3.bf16.msra.mxu1 %v1020_v10 }
  0x95   : > { %876 = vmatprep.subr.bf16.mxu0 %v1229_v0  ;;  %896 = vmatprep.subr.bf16.mxu1 %v1229_v0 }
  0x98   : > { %877 = vmatpush3.bf16.msra.mxu0 %v1013_v7  ;;  %897 = vmatpush3.bf16.msra.mxu1 %v1021_v12 }
  0x99   : > { %878 = vmatprep.subr.bf16.mxu0 %v1229_v0  ;;  %898 = vmatprep.subr.bf16.mxu1 %v1229_v0 }
  0x9c   : > { %879 = vmatpush3.bf16.msra.mxu0 %v1014_v9  ;;  %899 = vmatpush3.bf16.msra.mxu1 %v1022_v15 }
  0x9d   : > { %880 = vmatprep.subr.bf16.mxu0 %v1229_v0  ;;  %900 = vmatprep.subr.bf16.mxu1 %v1229_v0 }
  0xa0   : > { %881 = vmatpush3.bf16.msra.mxu0 %v1015_v11  ;;  %901 = vmatpush3.bf16.msra.mxu1 %v1023_v17 }
  0xa1   : > { %882 = vmatprep.subr.bf16.mxu0 %v1229_v0  ;;  %902 = vmatprep.subr.bf16.mxu1 %v1229_v0 }
  0xa4   : > { %883 = vmatpush3.bf16.msra.mxu0 %v1016_v13  ;;  %903 = vmatpush3.bf16.msra.mxu1 %v1024_v18 }
  0xa5   : > { %908 = vmatprep.subr.bf16.mxu0 %v1229_v0 }
  0xa7   : > { %885 = vmatmul.mubr.bf16.vlgmr.msra.gmra.mrb[0].mxu0 %v340_v16 }
  0xa8   : > { %924 = vmatprep.mubr.msk.bf16.mxu0 %vm1230_vm0, %v1229_v0  ;;  %909 = vmatpush3.bf16.msra.mxu0 %v1025_v19 }
  0xa9   : > { %910 = vmatprep.subr.bf16.mxu0 %v1229_v0 }
  0xac   : > { %911 = vmatpush3.bf16.msra.mxu0 %v1026_v20 }
  0xad   : > { %912 = vmatprep.subr.bf16.mxu0 %v1229_v0 }
  0xb0   : > { %913 = vmatpush3.bf16.msra.mxu0 %v1027_v21 }
  0xb1   : > { %914 = vmatprep.subr.bf16.mxu0 %v1229_v0 }
  0xb4   : > { %915 = vmatpush3.bf16.msra.mxu0 %v1028_v22 }
  0xb5   : > { %916 = vmatprep.subr.bf16.mxu0 %v1229_v0 }
  0xb8   : > { %917 = vmatpush3.bf16.msra.mxu0 %v1029_v23 }
  0xb9   : > { %918 = vmatprep.subr.bf16.mxu0 %v1229_v0 }
  0xbc   : > { %919 = vmatpush3.bf16.msra.mxu0 %v1030_v24 }
  0xbd   : > { %920 = vmatprep.subr.bf16.mxu0 %v1229_v0 }
  0xc0   : > { %921 = vmatpush3.bf16.msra.mxu0 %v1031_v33 }
  0xc1   : > { %922 = vmatprep.subr.bf16.mxu0 %v1229_v0 }
  0xc4   : > { %923 = vmatpush3.bf16.msra.mxu0 %v1032_v34 }
 0x17a   : > { %v446_v26 = vpop.f32.mrb[0].mxu0 }
 0x17b   : > { %v447_v27 = vadd.f32 %v810_v25, %v446_v26  ;;  %v886_v28 = vpop.f32.mrb[1].mxu0 }
 0x17c   : > { %v449_v29 = vpop.f32.mrb[2].mxu0 }
 0x17d   : > { %v452_v30 = vmax.f32 %v447_v27, 0.0  ;;  %v887_v31 = vpop.f32.mrb[3].mxu0 }
 0x17f   : > { %v455_v32 = vpack.c.bf16 %v452_v30, %v452_v30 }
 0x181   : > { %905 = vmatmul.mubr.bf16.vlgmr.msra.gmra.mrb[0].mxu1 %v455_v32 }
 0x254   : > { %v561_v36 = vpop.f32.mrb[0].mxu1 }
 0x255   : > { %v562_v37 = vadd.f32 %v819_v35, %v561_v36  ;;  %v906_v38 = vpop.f32.mrb[1].mxu1 }
 0x256   : > { %v564_v39 = vpop.f32.mrb[2].mxu1 }
 0x257   : > { %v567_v40 = vmax.f32 %v562_v37, 0.0  ;;  %v907_v41 = vpop.f32.mrb[3].mxu1 }
 0x259   : > { %v570_v42 = vpack.c.bf16 %v567_v40, %v567_v40 }
 0x25b   : > { %925 = vmatmul.mubr.bf16.vlgmr.msra.gmra.mrb[4].mxu0 %v570_v42 }
 0x32e   : > { %v676_v44 = vpop.f32.mrb[4].mxu0 }
 0x32f   : > { %v677_v45 = vadd.f32 %v828_v43, %v676_v44  ;;  %v926_v46 = vpop.f32.mrb[5].mxu0 }
 0x330   : > { %v679_v47 = vpop.f32.mrb[6].mxu0 }
 0x331   : > { %682 = vst [vmem:[%s337_s20] sm:$0xff] %v677_v45  ;;  %v927_v48 = vpop.f32.mrb[7].mxu0 }
 0x332   : > { %1160 = shalt.err (!%p1157_p4)
}
 0x333   : > { %s1161_s8 = scalar_lea.hbm %s1537_s21, 128  ;;  %s1165_s11 = scalar_lea.hbm %s1588_s7, 256 }
 0x334   : > { %p1162_p0 = scmp.ne.s32.totalorder %s1537_s21, %s1161_s8  ;;  %p1166_p8 = scmp.lt.u32.totalorder %s1537_s21, %s1588_s7 }
 0x335   : > { %p1167_p13 = scmp.lt.u32.totalorder %s1165_s11, %s1161_s8  ;;  %p1169_p10 = scmp.lt.u32.totalorder %s1161_s8, %s1537_s21 }
 0x336   : > { %p1163_p9 = pnand %p1162_p0, %p1426_p5 }
 0x337   : > { %p1168_p6 = por %p1167_p13, %p1166_p8 }
 0x338   : > { %p1164_p11 = pneg %p1163_p9 }
 0x339   : > { %p1170_p3 = por %p1169_p10, %p1168_p6 }
 0x33b   : > { %p1171_p7 = pnand %p1170_p3, %p1164_p11 }
 0x33d   : > { %1174 = shalt.err (!%p1171_p7)
}
 0x33e   : > { %942 = dma.vmem_to_hbm [thread:$0]  (%p1426_p5), %s1539_s15, 128, %s1537_s21, %s684_s28  }
 0x33f PF: > { %s1608_s20 = sld [smem:[#allocation17_spill]]  ;;  %s709_s29 = sand.u32 1, %s1209_s24  }
 0x340   : > { %p1610_p1 = scmp.ge.s32.totalorder %s1221_s27, 2  ;;  %s710_s12 = scalar_lea.sflag [#allocation6], %s709_s29 }
 0x345   : > { %p1609_p12 = scmp.ne.s32.totalorder %s1608_s20, 0 }
 0x347   : > { %p959_p2 = pnand %p1610_p1, %p1609_p12 }
 0x349   : > { %1204 = dma.done.wait (!%p959_p2), %s710_s12, 128  }
 0x34a   : > { %1206 = vsyncadd (!%p959_p2), %s710_s12, 4294967168  ;;  %p22_p4 = scmp.ge.s32.totalorder %s1412_s22, 4   ;;  %s1611_s24 = smov %s1213_s25 }
 0x34b   : > { %s1612_s25 = smov %s1217_s26  ;;  %s1613_s26 = smov %s1422_s18 }
 0x34c   : > { %s1614_s27 = smov %s1412_s22  ;;  %24 = sbr.rel (!%p22_p4) target bundleno = 7 (0x7), region = 105 }
 0x353   :  { %715 = vsyncpa [#allocation5], 1 }
 0x354   :  { %717 = vsyncpa [#allocation5 + $0x1], 1 }
 0x355   :  { %718 = vsyncpa [#allocation8], 1 }
 0x356   :  { %719 = vsyncpa [#allocation11], 1 }
 0x357   :  { %720 = vsyncpa [#allocation6], 1 }
 0x358   :  { %722 = vsyncpa [#allocation6 + $0x1], 1 }

</bundles_post_ra>
